<compile_context>
chip_gen: v7x
topology: tpu7x:2x2x1
jax: 0.10.0
libtpu: 0.0.40
codegen_flags: <defaults>
</compile_context>

<pallas_src>
import math
from math import ceil, log

import numpy as np
import jax
import jax.numpy as jnp
from jax.experimental import pallas as pl
from jax.experimental.pallas import tpu as pltpu

# ---------------- synthetic config (small, consistent with the module) ----------------
N_SKILLS = 8
SEQ = 8
EXT_FW = 1            # extend_forward
EXT_BW = 0            # extend_backward (must be 0 for the module's shape assert)
BATCH = 2
HID = 32              # eddkt['hidden_size']
N_LAYERS = 2          # eddkt['n_layers']
KSVECTOR_L1_COEF = 0.5

NUM_EMB = 2 * N_SKILLS + 2          # vocab / output_dim (18)
EMB = ceil(log(2 * N_SKILLS))       # embedding dim (3 for n_skills=8)
VOCAB = NUM_EMB

T_ENC = SEQ - EXT_FW - 1            # 6
T_DEC = EXT_BW + EXT_FW + 1         # 2

# TPU-native padded sizes
B_PAD = 8                            # sublane width
GW = 4 * HID                         # 128: all four gates packed into a single lane block
V_PAD = 128                          # lane-dense head width per (wrong|correct) half
NUM_EMB_PAD = ((NUM_EMB + 7) // 8) * 8   # 24

_VMEM = pl.BlockSpec(memory_space=pltpu.MemorySpace.VMEM)
_SMEM = pl.BlockSpec(memory_space=pltpu.MemorySpace.SMEM)

# +1 -> pltpu.roll(x, s) == jnp.roll(x, s); -1 -> opposite convention.  Set by the probe in main.
_ROLL_SIGN = 1


def _gate_shift(q):
    """Static roll amount that moves gate-quarter q (lanes q*HID..q*HID+HID-1) onto lanes 0..HID-1."""
    return (-_ROLL_SIGN * q * HID) % GW


def _detect_roll_sign():
    """Probe pltpu.roll's rotation convention once (trace-time constant either way)."""
    def k(x_ref, o_ref):
        o_ref[...] = pltpu.roll(x_ref[...], 1, 1)
    x = jax.lax.broadcasted_iota(jnp.float32, (8, 128), 1)
    y = pl.pallas_call(k, out_shape=jax.ShapeDtypeStruct((8, 128), jnp.float32),
                       in_specs=[_VMEM], out_specs=_VMEM)(x)
    return 1 if float(y[0, 0]) == 127.0 else -1


# ---------------- fused Pallas kernel ----------------
def _geddkt_fused_kernel(x_ref,
                         enc_tbl, dec_tbl,
                         e0_whh, e1_wih, e1_whh, e1_b,
                         d0_whh, d1_wih, d1_whh, d1_b,
                         w_head, b_head,
                         pred_ref,
                         xp_enc_ref, xp_dec_ref,
                         h_enc0_ref, h_dec0_ref, h_dec1_ref):
    """Whole GEDDKT forward: token->proj gather, enc LSTM x2, dec LSTM x2, output head.

    x_ref       : SMEM (BATCH*SEQ*2,) int32  raw xseq flattened as [b, t, {skill, correct}]
    enc/dec_tbl : VMEM (NUM_EMB_PAD, 1, GW) f32  per-token  emb @ W_ih^T + (b_ih+b_hh)  of layer 0
    *_whh       : VMEM (GW, GW) bf16  W_hh^T, gates packed along 128 lanes, rows >= HID zero
    e1/d1_wih   : VMEM (GW, GW) bf16  layer-1 W_ih^T (rows >= HID zero)
    e1/d1_b     : VMEM (1, GW)  f32   layer-1 b_ih + b_hh
    w_head      : VMEM (GW, 2*V_PAD) bf16  [wrong | correct] output columns (rows >= HID zero)
    b_head      : VMEM (1, 2*V_PAD)  f32
    pred_ref    : (T_DEC*B_PAD, V_PAD) f32  lane-dense correct-probability slab
    """
    shf_f = _gate_shift(1)
    shf_g = _gate_shift(2)
    shf_o = _gate_shift(3)

    # ---- fused embedding + layer-0 input projection: row gather driven by SMEM token ids ----
    def gather_proj(tbl_ref, xp_ref, t0, T):
        for t in range(T):
            for b in range(BATCH):
                base = (b * SEQ + t0 + t) * 2
                tok = x_ref[base] + N_SKILLS * x_ref[base + 1]
                xp_ref[t, b:b + 1, :] = tbl_ref[tok]           # dynamic leading-axis row gather
            # deterministic filler for the padded batch rows (never read back outside)
            xp_ref[t, BATCH:B_PAD, :] = jnp.zeros((B_PAD - BATCH, GW), jnp.float32)

    gather_proj(enc_tbl, xp_enc_ref, 0, T_ENC)
    gather_proj(dec_tbl, xp_dec_ref, T_ENC, T_DEC)

    def run_lstm(x_proj, h0, c0, whh_ref, out_seq_ref):
        # x_proj: (T, B_PAD, GW) f32, already = x @ W_ih^T + (b_ih + b_hh) (hoisted off the chain).
        # Gate layout along lanes: [ i | f | g | o ], HID lanes each.  State h/c lives in lanes
        # 0..HID-1; lanes >= HID carry bounded junk (roll wrap-around) that never reaches any
        # matmul because every weight matrix has zero rows >= HID.
        whh = whh_ref[...]                                     # bf16 (GW, GW) = 8 vregs
        h, c = h0, c0
        T = x_proj.shape[0]
        for t in range(T):                                     # tiny & static -> fully unrolled
            gates = x_proj[t] + jnp.dot(h.astype(jnp.bfloat16), whh,
                                        preferred_element_type=jnp.float32)
            sig = jax.nn.sigmoid(gates)                        # i | f | . | o   (one EUP vreg)
            tnh = jnp.tanh(gates)                              # . | . | g | .   (one EUP vreg)
            f = pltpu.roll(sig, shf_f, 1)                      # XLU: f -> lanes 0..HID-1
            g = pltpu.roll(tnh, shf_g, 1)                      # XLU: g -> lanes 0..HID-1
            o = pltpu.roll(sig, shf_o, 1)                      # XLU: o -> lanes 0..HID-1
            c = f * c + sig * g                                # 'sig' lanes 0..HID-1 are the i gate
            h = o * jnp.tanh(c)
            if out_seq_ref is not None:
                out_seq_ref[t] = h
        return h, c

    def in_proj(hseq, wih_ref, b_ref):
        # Hoisted layer-1 input projection: one batched MXU matmul, off the serial chain.
        T, Bp, _ = hseq.shape
        y = jnp.dot(hseq.reshape(T * Bp, GW).astype(jnp.bfloat16), wih_ref[...],
                    preferred_element_type=jnp.float32) + b_ref[...]
        return y.reshape(T, Bp, GW)

    zeros = jnp.zeros((B_PAD, GW), jnp.float32)

    # ---- encoder (2 layers); final (h, c) of each layer seeds the matching decoder layer ----
    eh0, ec0 = run_lstm(xp_enc_ref[...], zeros, zeros, e0_whh, h_enc0_ref)
    eh1, ec1 = run_lstm(in_proj(h_enc0_ref[...], e1_wih, e1_b), zeros, zeros, e1_whh, None)

    # ---- decoder (2 layers) ----
    run_lstm(xp_dec_ref[...], eh0, ec0, d0_whh, h_dec0_ref)
    run_lstm(in_proj(h_dec0_ref[...], d1_wih, d1_b), eh1, ec1, d1_whh, h_dec1_ref)

    # ---- fused output head: one (16,128)x(128,256) matmul, one sigmoid, EUP reciprocal ----
    hflat = h_dec1_ref[...].reshape(T_DEC * B_PAD, GW)
    logits = jnp.dot(hflat.astype(jnp.bfloat16), w_head[...],
                     preferred_element_type=jnp.float32) + b_head[...]
    probs = jax.nn.sigmoid(logits)
    o_wro = probs[:, :V_PAD]
    o_cor = probs[:, V_PAD:]
    # padded lanes have zero logits -> 0.5/(0.5+0.5); never NaN; sliced away in the wrapper.
    pred_ref[...] = o_cor * pl.reciprocal(o_cor + o_wro, approx=True)


def fused_forward(x_flat, pp):
    """x_flat: (BATCH*SEQ*2,) int32.  Returns (T_DEC*B_PAD, V_PAD) f32 prediction slab."""
    args = [x_flat,
            pp['enc_tbl'], pp['dec_tbl'],
            pp['e0_whh'], pp['e1_wih'], pp['e1_whh'], pp['e1_b'],
            pp['d0_whh'], pp['d1_wih'], pp['d1_whh'], pp['d1_b'],
            pp['w_head'], pp['b_head']]
    in_specs = [_SMEM] + [_VMEM] * (len(args) - 1)

    mm = lambda m, k, n: 2 * m * k * n
    steps = 2 * (T_ENC + T_DEC)
    flops = int(steps * mm(B_PAD, GW, GW)                               # serial h @ W_hh
                + mm(T_ENC * B_PAD, GW, GW) + mm(T_DEC * B_PAD, GW, GW)  # layer-1 input proj
                + mm(T_DEC * B_PAD, GW, 2 * V_PAD))                      # head
    transcendentals = int(steps * 3 * B_PAD * GW + T_DEC * B_PAD * 2 * V_PAD)
    bytes_accessed = int(sum(int(np.prod(a.shape)) * a.dtype.itemsize for a in args)
                         + T_DEC * B_PAD * V_PAD * 4)

    # Gridless call: total resident footprint (~0.4 MiB of weights + a few KiB of scratch) is far
    # under every generation's VMEM (incl. v7x's 64 MiB), so no tiling / grid is needed.
    # TODO(synk): if batch ever grows, add a leading "parallel" grid axis over B_PAD-row tiles so
    # v7x's two TensorCores split the batch and the weight DMA pipelines behind compute.
    return pl.pallas_call(
        _geddkt_fused_kernel,
        out_shape=jax.ShapeDtypeStruct((T_DEC * B_PAD, V_PAD), jnp.float32),
        in_specs=in_specs,
        out_specs=_VMEM,
        scratch_shapes=[
            pltpu.VMEM((T_ENC, B_PAD, GW), jnp.float32),   # layer-0 encoder input projection
            pltpu.VMEM((T_DEC, B_PAD, GW), jnp.float32),   # layer-0 decoder input projection
            pltpu.VMEM((T_ENC, B_PAD, GW), jnp.float32),   # encoder layer-0 h sequence
            pltpu.VMEM((T_DEC, B_PAD, GW), jnp.float32),   # decoder layer-0 h sequence
            pltpu.VMEM((T_DEC, B_PAD, GW), jnp.float32),   # decoder layer-1 h sequence
        ],
        cost_estimate=pl.CostEstimate(flops=flops, transcendentals=transcendentals,
                                      bytes_accessed=bytes_accessed),
    )(*args)


# ---------------- parameter init (deterministic, synthetic, PyTorch-like layout) ----------------
def init_params(key):
    k_hid = 1.0 / math.sqrt(HID)
    params = {}
    key, *ks = jax.random.split(key, 5)
    params['enc_emb'] = jax.random.normal(ks[0], (NUM_EMB, EMB), jnp.float32)
    params['dec_emb'] = jax.random.normal(ks[1], (NUM_EMB, EMB), jnp.float32)
    params['w_out_t'] = jax.random.uniform(ks[2], (HID, VOCAB), jnp.float32, -k_hid, k_hid)
    params['b_out'] = jax.random.uniform(ks[3], (1, VOCAB), jnp.float32, -k_hid, k_hid)

    def lstm_stack(key):
        layers = []
        for l in range(N_LAYERS):
            in_sz = EMB if l == 0 else HID
            key, k1, k2, k3 = jax.random.split(key, 4)
            layers.append({
                'wih_t': jax.random.uniform(k1, (in_sz, 4 * HID), jnp.float32, -k_hid, k_hid),
                'whh_t': jax.random.uniform(k2, (HID, 4 * HID), jnp.float32, -k_hid, k_hid),
                'b': jax.random.uniform(k3, (1, 4 * HID), jnp.float32, -k_hid, k_hid),
            })
        return layers, key

    params['enc_lstm'], key = lstm_stack(key)
    params['dec_lstm'], key = lstm_stack(key)
    return params


# ---------------- padding / repacking to TPU-native layout (done ONCE, outside the jit) ---------
def prepare_padded_params(params):
    f32, bf16 = jnp.float32, jnp.bfloat16
    S = N_SKILLS

    def pad_rows(w, rows):
        return jnp.zeros((rows, w.shape[1]), f32).at[:w.shape[0]].set(w)

    def proj_table(emb, layer0):
        # Fold embedding + layer-0 input projection + layer-0 bias into one per-token f32 table.
        tbl = emb @ layer0['wih_t'] + layer0['b']                 # (NUM_EMB, GW)
        return pad_rows(tbl, NUM_EMB_PAD).reshape(NUM_EMB_PAD, 1, GW)

    def pad_sq_bf16(w):                                           # (HID, GW) -> (GW, GW) bf16
        return pad_rows(w, GW).astype(bf16)

    enc, dec = params['enc_lstm'], params['dec_lstm']
    pp = {
        'enc_tbl': proj_table(params['enc_emb'], enc[0]),
        'dec_tbl': proj_table(params['dec_emb'], dec[0]),
        'e0_whh': pad_sq_bf16(enc[0]['whh_t']),
        'e1_wih': pad_sq_bf16(enc[1]['wih_t']),
        'e1_whh': pad_sq_bf16(enc[1]['whh_t']),
        'e1_b': enc[1]['b'],
        'd0_whh': pad_sq_bf16(dec[0]['whh_t']),
        'd1_wih': pad_sq_bf16(dec[1]['wih_t']),
        'd1_whh': pad_sq_bf16(dec[1]['whh_t']),
        'd1_b': dec[1]['b'],
    }
    w_out_t, b_out = params['w_out_t'], params['b_out']
    w_head = jnp.zeros((GW, 2 * V_PAD), f32)
    w_head = w_head.at[:HID, :S].set(w_out_t[:, 2:2 + S])
    w_head = w_head.at[:HID, V_PAD:V_PAD + S].set(w_out_t[:, 2 + S:2 + 2 * S])
    b_head = jnp.zeros((1, 2 * V_PAD), f32)
    b_head = b_head.at[:, :S].set(b_out[:, 2:2 + S])
    b_head = b_head.at[:, V_PAD:V_PAD + S].set(b_out[:, 2 + S:2 + 2 * S])
    pp['w_head'] = w_head.astype(bf16)
    pp['b_head'] = b_head
    return pp


# ---------------- forward (mirrors GEDDKT.forward, non-generative, eval mode) ----------------
def geddkt_forward(pp, xseq, yseq, mask=None):
    # mask unused: module's pad=False branch does not filter predictions/targets.
    S = N_SKILLS
    B = xseq.shape[0]
    x_flat = xseq.reshape(-1).astype(jnp.int32)       # raw tokens; all x-path glue is in-kernel

    # ---- single fused Pallas kernel: token gather + enc LSTM x2 + dec LSTM x2 + head ----
    pred_flat = fused_forward(x_flat, pp)             # (T_DEC*B_PAD, V_PAD)
    pred_vect = pred_flat.reshape(T_DEC, B_PAD, V_PAD)[:, :B, :S]

    # ---- losses / stats (small glue, plain JAX) ----
    y = jnp.transpose(yseq, (1, 0, 2))                # (SEQ, B, 2)
    y_dec = y[T_ENC:]
    yqs = jax.nn.one_hot(y_dec[..., 0], S, dtype=jnp.float32)    # (T_DEC, B, S)
    target = y_dec[..., 1].astype(jnp.float32)                   # (T_DEC, B)

    pred_prob = jnp.max(pred_vect * yqs, axis=2)                 # (T_DEC, B)
    eps = 1e-7
    p = jnp.clip(pred_prob, eps, 1.0 - eps)                      # clamp to avoid -inf/NaN in BCE
    bce = -jnp.mean(target * jnp.log(p) + (1.0 - target) * jnp.log(1.0 - p))

    dqa = yqs * target[..., None]
    Sdqa = jnp.cumsum(dqa, axis=0)
    Sdq = jnp.cumsum(yqs, axis=0)
    denom = Sdq.shape[0] * Sdq.shape[1] * Sdq.shape[2]
    ksvector_l1 = jnp.sum(jnp.abs(Sdq * pred_vect - Sdqa)) / denom
    loss = bce + KSVECTOR_L1_COEF * ksvector_l1

    # TODO(synk): generative decoding branch (python random teacher forcing) and training-mode
    # dropout are not translated (eval-mode, non-generative semantics only).
    return {'loss': loss, 'pred_vect': pred_vect, 'pred_prob': pred_prob,
            'filtered_pred': pred_prob, 'filtered_target': target,
            'ksvector_l1': ksvector_l1, 'Sdqa': Sdqa, 'Sdq': Sdq}


# ---------------- pure-JAX reference (unpadded f32 params; correctness check) ----------------
def _ref_lstm_layer(x, h0, c0, wih_t, whh_t, b):
    T = x.shape[0]
    H = h0.shape[-1]
    h, c = h0, c0
    hs = []
    for t in range(T):
        gates = x[t] @ wih_t + h @ whh_t + b
        i = jax.nn.sigmoid(gates[:, :H])
        f = jax.nn.sigmoid(gates[:, H:2 * H])
        g = jnp.tanh(gates[:, 2 * H:3 * H])
        o = jax.nn.sigmoid(gates[:, 3 * H:4 * H])
        c = f * c + i * g
        h = o * jnp.tanh(c)
        hs.append(h)
    return jnp.stack(hs), h, c


def _ref_pred_vect(params, xseq):
    S = N_SKILLS
    x = jnp.transpose(xseq, (1, 0, 2))
    input_enc = x[:T_ENC, :, 0] + S * x[:T_ENC, :, 1]
    input_dec = x[T_ENC:, :, 0] + S * x[T_ENC:, :, 1]
    h = params['enc_emb'][input_enc]
    zeros = jnp.zeros((BATCH, HID), jnp.float32)
    hTs, cTs = [], []
    for l in range(N_LAYERS):
        p = params['enc_lstm'][l]
        h, hT, cT = _ref_lstm_layer(h, zeros, zeros, p['wih_t'], p['whh_t'], p['b'])
        hTs.append(hT); cTs.append(cT)
    d = params['dec_emb'][input_dec]
    for l in range(N_LAYERS):
        p = params['dec_lstm'][l]
        d, _, _ = _ref_lstm_layer(d, hTs[l], cTs[l], p['wih_t'], p['whh_t'], p['b'])
    T, B, _ = d.shape
    logits = d.reshape(T * B, HID) @ params['w_out_t'] + params['b_out']
    o_wro = jax.nn.sigmoid(logits[:, 2:2 + S])
    o_cor = jax.nn.sigmoid(logits[:, 2 + S:2 + 2 * S])
    return (o_cor / (o_cor + o_wro)).reshape(T, B, S)


if __name__ == "__main__":
    # probe pltpu.roll's convention once; gate-alignment shifts become trace-time constants
    _ROLL_SIGN = _detect_roll_sign()

    key = jax.random.PRNGKey(0)
    key_params, key_data = jax.random.split(key)
    params = init_params(key_params)
    padded = prepare_padded_params(params)   # repacking done once, outside the jitted forward

    kq, ka, kyq, kya = jax.random.split(key_data, 4)
    xq = jax.random.randint(kq, (BATCH, SEQ), 0, N_SKILLS)
    xa = jax.random.randint(ka, (BATCH, SEQ), 0, 2)
    yq = jax.random.randint(kyq, (BATCH, SEQ), 0, N_SKILLS)
    ya = jax.random.randint(kya, (BATCH, SEQ), 0, 2)
    xseq = jnp.stack([xq, xa], axis=-1).astype(jnp.int32)   # (B, SEQ, 2)
    yseq = jnp.stack([yq, ya], axis=-1).astype(jnp.int32)   # (B, SEQ, 2)
    mask = jnp.ones((BATCH, SEQ), dtype=bool)

    fwd = jax.jit(lambda x, y: geddkt_forward(padded, x, y, mask))
    out = fwd(xseq, yseq)
    jax.block_until_ready(out['loss'])

    # correctness check against the pure-f32 JAX reference on the original (unpadded) parameters;
    # tolerance accounts for bf16 MXU operands and the approximate reciprocal.
    ref = _ref_pred_vect(params, xseq)
    np.testing.assert_allclose(np.asarray(out['pred_vect']), np.asarray(ref),
                               rtol=2e-2, atol=2e-2)
    assert np.isfinite(float(out['loss']))
    print("KERNEL_OK")
</pallas_src>

<mosaic_0001>
module attributes {stable_mosaic.version = 11 : i64} {
  func.func @k(%arg0: memref<8x128xf32, #tpu.memory_space<vmem>>, %arg1: memref<8x128xf32, #tpu.memory_space<vmem>>) attributes {dimension_semantics = [], scalar_prefetch = 0 : i64, scratch_operands = 0 : i64, tpu.core_type = #tpu.core_type<tc>} {
    %c0 = arith.constant 0 : index
    %c0_0 = arith.constant 0 : index
    %0 = vector.load %arg0[%c0, %c0_0] : memref<8x128xf32, #tpu.memory_space<vmem>>, vector<8x128xf32>
    %c1_i32 = arith.constant 1 : i32
    %1 = tpu.dynamic_rotate %0 by %c1_i32 dim 1 : vector<8x128xf32>, i32 -> vector<8x128xf32>
    %c0_1 = arith.constant 0 : index
    %c0_2 = arith.constant 0 : index
    %2 = vector.load %arg1[%c0_1, %c0_2] : memref<8x128xf32, #tpu.memory_space<vmem>>, vector<8x128xf32>
    tpu.vector_store %arg1[%c0_1, %c0_2], %1 {strides = array<i32>} : memref<8x128xf32, #tpu.memory_space<vmem>>, vector<8x128xf32>,
    return
  }
}

</mosaic_0001>

<bundles_post_ra>
// kernel: tpu_custom_call.1
= control target key start
LH: loop header
LB: loop body
LE: loop exit
PB: predicated region body
PF: predicated region fallthrough
CT: control target
= control target key end

     0   :  { %6 = vsyncpa [#allocation3], 0  ;;  %s128_s0 = inlined_call_operand.hbm [shape: f32[8,128], index: 0, kind: input, shape index: {}]   ;;  %s129_s1 = inlined_call_operand.hbm [shape: f32[8,128], index: 1, kind: output, shape index: {}]  }
   0x1   :  { %7 = vsyncpa [#allocation4], 0  ;;  %s91_s6 = smov [#allocation2]   ;;  %s43_s10 = scalar_lea.hbm %s128_s0, 128 }
   0x2   :  { %s14_s7 = sshll.u32 %s91_s6, 4  ;;  %p44_p0 = scmp.ne.s32.totalorder %s128_s0, %s43_s10  ;;  %s15_s7 = int_to_ptr.vmem [resolvable:$true] %s14_s7 }
   0x3   :  { %p47_p1 = scmp.lt.u32.totalorder %s43_s10, %s128_s0 }
   0x5   :  { %p49_p2 = pnand %p47_p1, %p44_p0 }
   0x7   :  { %52 = shalt.err (!%p49_p2)
}
   0x8   :  { %s53_s15 = scalar_lea.vmem %s15_s7, 128  ;;  %p58_p4 = scmp.lt.s32.totalorder %s15_s7, %s15_s7 }
   0x9   :  { %p54_p3 = scmp.ne.s32.totalorder %s15_s7, %s53_s15  ;;  %p59_p5 = scmp.lt.s32.totalorder %s53_s15, %s53_s15 }
   0xb   :  { %p60_p6 = por %p59_p5, %p58_p4 }
   0xd   :  { %p61_p7 = pnand %p60_p6, %p54_p3 }
   0xf   :  { %64 = shalt.err (!%p61_p7)
}
  0x10   :  { %17 = dma.hbm_to_vmem [thread:$0]  %s128_s0, 128, %s15_s7, [#allocation3]  }
  0x11   :  { %87 = dma.done.wait [#allocation3], 128  }
  0x12   :  { %88 = vsyncadd [#allocation3], 4294967168  ;;  %v21_v0 = vld [vmem:[#allocation2] sm:$0xff]  ;;  %s92_s18 = smov 1   ;;  %s93_s19 = smov [#allocation5]  }
  0x13   :  { %22 = vrot.lane.b32.xlu0 %v21_v0, %s92_s18  ;;  %s31_s20 = sshll.u32 %s93_s19, 4  ;;  %s32_s20 = int_to_ptr.vmem [resolvable:$true] %s31_s20 }
  0x14   :  { %s65_s21 = scalar_lea.vmem %s32_s20, 128  ;;  %p70_p9 = scmp.lt.s32.totalorder %s32_s20, %s32_s20 }
  0x15   :  { %p66_p8 = scmp.ne.s32.totalorder %s32_s20, %s65_s21  ;;  %p71_p10 = scmp.lt.s32.totalorder %s65_s21, %s65_s21 }
  0x17   :  { %p72_p11 = por %p71_p10, %p70_p9 }
  0x19   :  { %p73_p12 = pnand %p72_p11, %p66_p8 }
  0x85   :  { %v23_v1 = vpop.permute.xlu0 %22 }
  0x86   :  { %24 = vst [vmem:[#allocation5] sm:$0xff] %v23_v1 }
  0x87   :  { %76 = shalt.err (!%p73_p12)
}
  0x88   :  { %s77_s0 = scalar_lea.hbm %s129_s1, 128 }
  0x89   :  { %p78_p13 = scmp.ne.s32.totalorder %s129_s1, %s77_s0  ;;  %p81_p0 = scmp.lt.u32.totalorder %s77_s0, %s129_s1 }
  0x8b   :  { %p83_p1 = pnand %p81_p0, %p78_p13 }
  0x8d   :  { %86 = shalt.err (!%p83_p1)
}
  0x8e   :  { %34 = dma.vmem_to_hbm [thread:$0]  %s32_s20, 128, %s129_s1, [#allocation4]  }
  0x8f   :  { %89 = dma.done.wait [#allocation4], 128  }
  0x90   :  { %90 = vsyncadd [#allocation4], 4294967168 }
  0x91   :  { %38 = vsyncpa [#allocation3], 1 }
  0x92   :  { %39 = vsyncpa [#allocation4], 1 }

</bundles_post_ra>
